<compile_context>
chip_gen: v6e
topology: v6e:2x2x1
jax: 0.10.0
libtpu: 0.0.40
codegen_flags: <defaults>
</compile_context>

<pallas_src>
import numpy as np
import jax
import jax.numpy as jnp
from jax.experimental import pallas as pl
from jax.experimental.pallas import tpu as pltpu


_TILE_BYTES_BUDGET = 6 * 1024 * 1024      # per x/out tile; ~4 live tiles => ~24 MiB
_VMEM_LIMIT_BYTES = 48 * 1024 * 1024      # < v7x 64 MiB physical, > v5e/v6e defaults


def _round_up(x: int, m: int) -> int:
    return ((x + m - 1) // m) * m


def _sublane_tile(dtype) -> int:
    # native sublane packing: 8 (4-byte), 16 (2-byte), 32 (1-byte)
    return max(8, 32 // jnp.dtype(dtype).itemsize)


# ----------------------------- kernels ------------------------------------ #

def _scalar_activate_kernel(x_ref, w_ref, b_ref, o_ref):
    # way == 0: x block [b_blk, Cp]; w/b are (1, Cp), VMEM-resident across grid.
    x = x_ref[...].astype(jnp.float32)
    z = x * w_ref[...].astype(jnp.float32) + b_ref[...].astype(jnp.float32)
    o_ref[...] = (z * jax.nn.sigmoid(z)).astype(o_ref.dtype)


def _tensor_activate_kernel(x_ref, w_ref, b_ref, o_ref):
    # way > 0: x block [b_blk, C, Pp]; w/b are (C, 1), VMEM-resident.
    x = x_ref[...].astype(jnp.float32)                       # [b_blk, C, Pp]
    w = w_ref[...].astype(jnp.float32)[None, :, :]           # [1, C, 1]
    b = b_ref[...].astype(jnp.float32)[None, :, :]           # [1, C, 1]
    sq_norm = jnp.sum(x * x, axis=-1, keepdims=True)         # [b_blk, C, 1] (f32 acc)
    gate = jax.nn.sigmoid(w * sq_norm + b)                   # [b_blk, C, 1]
    o_ref[...] = (gate * x).astype(o_ref.dtype)


# ----------------------------- wrapper ------------------------------------ #

def tensor_activate_layer(x, weights, bias):
    """Forward pass of TensorActivateLayer.

    x       : [B, C, d1, ..., d_way]  (way may be 0)
    weights : [C]   (input_dim == C)
    bias    : [C]
    """
    way = x.ndim - 2
    B, C = x.shape[0], x.shape[1]
    dtype = x.dtype
    itemsize = jnp.dtype(dtype).itemsize
    sub = _sublane_tile(dtype)

    if way == 0:
        # ---- elementwise path: rows = batch on sublanes, channels on lanes --
        Cp = _round_up(C, 128)                      # lane-dense output
        xp = x if Cp == C else jnp.pad(x, ((0, 0), (0, Cp - C)))

        # batch tile: largest multiple of the sublane tile within the budget
        max_rows = max(sub, (_TILE_BYTES_BUDGET // (Cp * itemsize)) // sub * sub)
        b_blk = min(max_rows, _round_up(B, sub))
        Bp = _round_up(B, b_blk)
        if Bp != B:
            xp = jnp.pad(xp, ((0, Bp - B), (0, 0)))

        w2 = jnp.pad(weights.astype(dtype)[None, :], ((0, 0), (0, Cp - C)))
        b2 = jnp.pad(bias.astype(dtype)[None, :], ((0, 0), (0, Cp - C)))

        out = pl.pallas_call(
            _scalar_activate_kernel,
            out_shape=jax.ShapeDtypeStruct((Bp, Cp), dtype),
            grid=(Bp // b_blk,),
            in_specs=[
                pl.BlockSpec((b_blk, Cp), lambda i: (i, 0)),
                pl.BlockSpec((1, Cp), lambda i: (0, 0)),      # resident
                pl.BlockSpec((1, Cp), lambda i: (0, 0)),      # resident
            ],
            out_specs=pl.BlockSpec((b_blk, Cp), lambda i: (i, 0)),
            compiler_params=pltpu.CompilerParams(
                dimension_semantics=("parallel",),
                vmem_limit_bytes=_VMEM_LIMIT_BYTES),
        )(xp, w2, b2)
        return out[:B, :C]

    # ---- tensor path: keep [B, C, Pp], tile over batch -----------------------
    P = int(np.prod(x.shape[2:]))
    Pp = _round_up(P, 128)                          # lane-dense; zero-pad is
    x3 = x.reshape(B, C, P)                         # harmless for sum-of-squares
    if Pp != P:
        x3 = jnp.pad(x3, ((0, 0), (0, 0), (0, Pp - P)))

    bytes_per_batch_row = C * Pp * itemsize
    b_blk = max(1, min(B, _TILE_BYTES_BUDGET // bytes_per_batch_row))
    Bp = _round_up(B, b_blk)
    if Bp != B:
        x3 = jnp.pad(x3, ((0, Bp - B), (0, 0), (0, 0)))

    w2 = weights.astype(dtype).reshape(C, 1)        # per-channel, no B replication
    b2 = bias.astype(dtype).reshape(C, 1)

    out = pl.pallas_call(
        _tensor_activate_kernel,
        out_shape=jax.ShapeDtypeStruct((Bp, C, Pp), dtype),
        grid=(Bp // b_blk,),
        in_specs=[
            pl.BlockSpec((b_blk, C, Pp), lambda i: (i, 0, 0)),
            pl.BlockSpec((C, 1), lambda i: (0, 0)),           # resident
            pl.BlockSpec((C, 1), lambda i: (0, 0)),           # resident
        ],
        out_specs=pl.BlockSpec((b_blk, C, Pp), lambda i: (i, 0, 0)),
        compiler_params=pltpu.CompilerParams(
            dimension_semantics=("parallel",),
            vmem_limit_bytes=_VMEM_LIMIT_BYTES),
    )(x3, w2, b2)

    if Bp != B or Pp != P:
        out = out[:B, :, :P]
    return out.reshape(x.shape)


# ------------------------- reference (pure JAX) ---------------------------- #

def _reference(x, weights, bias):
    way = x.ndim - 2
    xf = x.astype(jnp.float32)
    wf = weights.astype(jnp.float32)
    bf = bias.astype(jnp.float32)
    if way == 0:
        z = wf[None, :] * xf + bf[None, :]
        return (z * jax.nn.sigmoid(z)).astype(x.dtype)
    red_axes = tuple(range(2, 2 + way))
    n = jnp.sum(xf * xf, axis=red_axes)                     # [B, C]
    gate = jax.nn.sigmoid(wf[None, :] * n + bf[None, :])
    gate = gate.reshape(gate.shape + (1,) * way)
    return (gate * xf).astype(x.dtype)


# --------------------------------- main ------------------------------------ #

if __name__ == "__main__":
    key = jax.random.PRNGKey(0)
    B, C, D = 2, 4, 16
    input_dim = C

    # Deterministic params exactly as in __init__: ones / zeros.
    weights = jnp.ones((input_dim,), jnp.float32)
    bias = jnp.zeros((input_dim,), jnp.float32)

    k0, k1, k2 = jax.random.split(key, 3)

    # way = 2 case: [B, C, D, D]  (P = 256, already lane-aligned)
    x_tensor = jax.random.normal(k0, (B, C, D, D), jnp.float32)
    out_tensor = jax.block_until_ready(tensor_activate_layer(x_tensor, weights, bias))
    ref_tensor = _reference(x_tensor, weights, bias)
    np.testing.assert_allclose(np.asarray(out_tensor), np.asarray(ref_tensor),
                               rtol=1e-5, atol=1e-5)

    # way = 1 case: [B, C, D]  (P = 16 -> exercises lane padding to 128)
    x_vec = jax.random.normal(k2, (B, C, D), jnp.float32)
    out_vec = jax.block_until_ready(tensor_activate_layer(x_vec, weights, bias))
    ref_vec = _reference(x_vec, weights, bias)
    np.testing.assert_allclose(np.asarray(out_vec), np.asarray(ref_vec),
                               rtol=1e-5, atol=1e-5)

    # way = 0 case: [B, C]  (exercises batch + channel padding)
    x_scalar = jax.random.normal(k1, (B, C), jnp.float32)
    out_scalar = jax.block_until_ready(tensor_activate_layer(x_scalar, weights, bias))
    ref_scalar = _reference(x_scalar, weights, bias)
    np.testing.assert_allclose(np.asarray(out_scalar), np.asarray(ref_scalar),
                               rtol=1e-5, atol=1e-5)

    print("KERNEL_OK")
</pallas_src>

<mosaic_0001>
module attributes {stable_mosaic.version = 11 : i64} {
  func.func @_tensor_activate_kernel(%arg0: i32, %arg1: memref<2x4x256xf32, #tpu.memory_space<vmem>>, %arg2: memref<4x1xf32, #tpu.memory_space<vmem>>, %arg3: memref<4x1xf32, #tpu.memory_space<vmem>>, %arg4: memref<2x4x256xf32, #tpu.memory_space<vmem>>) attributes {dimension_semantics = [#tpu.dimension_semantics<parallel>], iteration_bounds = array<i64: 1>, scalar_prefetch = 0 : i64, scratch_operands = 0 : i64, tpu.core_type = #tpu.core_type<tc>, window_params = [{transform_indices = @transform_0, window_bounds = array<i64: 2, 4, 256>}, {pipeline_mode = #tpu.pipeline_mode<synchronous>, transform_indices = @transform_1, window_bounds = array<i64: 4, 1>}, {pipeline_mode = #tpu.pipeline_mode<synchronous>, transform_indices = @transform_2, window_bounds = array<i64: 4, 1>}, {transform_indices = @transform_3, window_bounds = array<i64: 2, 4, 256>}]} {
    %c0 = arith.constant 0 : index
    %c0_0 = arith.constant 0 : index
    %c0_1 = arith.constant 0 : index
    %0 = vector.load %arg1[%c0, %c0_0, %c0_1] : memref<2x4x256xf32, #tpu.memory_space<vmem>>, vector<2x4x256xf32>
    %c0_2 = arith.constant 0 : index
    %c0_3 = arith.constant 0 : index
    %1 = vector.load %arg2[%c0_2, %c0_3] : memref<4x1xf32, #tpu.memory_space<vmem>>, vector<4x1xf32>
    %2 = vector.shape_cast %1 : vector<4x1xf32> to vector<1x4x1xf32>
    %c0_4 = arith.constant 0 : index
    %c0_5 = arith.constant 0 : index
    %3 = vector.load %arg3[%c0_4, %c0_5] : memref<4x1xf32, #tpu.memory_space<vmem>>, vector<4x1xf32>
    %4 = vector.shape_cast %3 : vector<4x1xf32> to vector<1x4x1xf32>
    %5 = arith.mulf %0, %0 : vector<2x4x256xf32>
    %cst = arith.constant dense<0.000000e+00> : vector<2x4xf32>
    %6 = vector.multi_reduction <add>, %5, %cst [2] : vector<2x4x256xf32> to vector<2x4xf32>
    %7 = vector.shape_cast %6 : vector<2x4xf32> to vector<2x4x1xf32>
    %8 = vector.broadcast %2 : vector<1x4x1xf32> to vector<2x4x1xf32>
    %9 = arith.mulf %8, %7 : vector<2x4x1xf32>
    %10 = vector.broadcast %4 : vector<1x4x1xf32> to vector<2x4x1xf32>
    %11 = arith.addf %9, %10 : vector<2x4x1xf32>
    %12 = arith.negf %11 : vector<2x4x1xf32>
    %13 = math.exp %12 : vector<2x4x1xf32>
    %cst_6 = arith.constant 1.000000e+00 : f32
    %14 = vector.broadcast %cst_6 : f32 to vector<2x4x1xf32>
    %15 = arith.addf %14, %13 : vector<2x4x1xf32>
    %16 = arith.divf %14, %15 : vector<2x4x1xf32>
    %17 = vector.broadcast %16 : vector<2x4x1xf32> to vector<2x4x256xf32>
    %18 = arith.mulf %17, %0 : vector<2x4x256xf32>
    %c0_7 = arith.constant 0 : index
    %c0_8 = arith.constant 0 : index
    %c0_9 = arith.constant 0 : index
    %19 = vector.load %arg4[%c0_7, %c0_8, %c0_9] : memref<2x4x256xf32, #tpu.memory_space<vmem>>, vector<2x4x256xf32>
    tpu.vector_store %arg4[%c0_7, %c0_8, %c0_9], %18 {strides = array<i32>} : memref<2x4x256xf32, #tpu.memory_space<vmem>>, vector<2x4x256xf32>,
    return
  }
  func.func @transform_0(%arg0: i32) -> (i32, i32, i32) {
    %c0_i32 = arith.constant 0 : i32
    %c0_i32_0 = arith.constant 0 : i32
    %c0_i32_1 = arith.constant 0 : i32
    return %arg0, %c0_i32, %c0_i32_0 : i32, i32, i32
  }
  func.func @transform_1(%arg0: i32) -> (i32, i32) {
    %c0_i32 = arith.constant 0 : i32
    %c0_i32_0 = arith.constant 0 : i32
    %c0_i32_1 = arith.constant 0 : i32
    return %c0_i32, %c0_i32_0 : i32, i32
  }
  func.func @transform_2(%arg0: i32) -> (i32, i32) {
    %c0_i32 = arith.constant 0 : i32
    %c0_i32_0 = arith.constant 0 : i32
    %c0_i32_1 = arith.constant 0 : i32
    return %c0_i32, %c0_i32_0 : i32, i32
  }
  func.func @transform_3(%arg0: i32) -> (i32, i32, i32) {
    %c0_i32 = arith.constant 0 : i32
    %c0_i32_0 = arith.constant 0 : i32
    %c0_i32_1 = arith.constant 0 : i32
    return %arg0, %c0_i32, %c0_i32_0 : i32, i32, i32
  }
}

</mosaic_0001>

<bundles_post_ra>
// kernel: tpu_custom_call.1
= control target key start
LH: loop header
LB: loop body
LE: loop exit
PB: predicated region body
PF: predicated region fallthrough
CT: control target
= control target key end

     0   :  { %8 = vsyncpa [#allocation3], 0  ;;  %s221_s0 = inlined_call_operand.hbm [shape: f32[2,4,256], index: 0, kind: input, shape index: {}]   ;;  %s222_s1 = inlined_call_operand.vmem [shape: f32[4,1], index: 1, kind: input, shape index: {}]   ;;  %s223_s2 = inlined_call_operand.vmem [shape: f32[4,1], index: 2, kind: input, shape index: {}]   ;;  %s224_s3 = inlined_call_operand.hbm [shape: f32[2,4,256], index: 3, kind: output, shape index: {}]  }
   0x1   :  { %9 = vsyncpa [#allocation4], 0  ;;  %s178_s12 = smov [#allocation2]  }
   0x2   :  { %s15_s13 = sshll.u32 %s178_s12, 4  ;;  %s16_s13 = int_to_ptr.vmem [resolvable:$true] %s15_s13 }
   0x3   :  { %s142_s14 = scalar_lea.vmem %s16_s13, 256  ;;  %p147_p1 = scmp.lt.s32.totalorder %s16_s13, %s16_s13 }
   0x4   :  { %p143_p0 = scmp.ne.s32.totalorder %s16_s13, %s142_s14  ;;  %p148_p2 = scmp.lt.s32.totalorder %s142_s14, %s142_s14 }
   0x6   :  { %p149_p3 = por %p148_p2, %p147_p1 }
   0x8   :  { %p150_p4 = pnand %p149_p3, %p143_p0 }
   0xa   :  { %153 = shalt.err (!%p150_p4)
}
   0xb   :  { %s179_s15 = smov 128   ;;  %s180_s16 = smov 8  }
   0xc   :  { %21 = dma.hbm_to_vmem [thread:$0]  %s221_s0, 256, %s16_s13, [#allocation3], %s179_s15, %s179_s15, %s180_s16  }
   0xd   :  { %174 = dma.done.wait [#allocation3], 256  }
   0xe   :  { %175 = vsyncadd [#allocation3], 4294967040  ;;  %v29_v0 = vld [vmem:[#allocation2] sm:$0xff]  ;;  %vm41_vm0 = vcmask 1043456   ;;  %v30_v1 = vld [vmem:[#allocation2 + $0x8] sm:$0xff]  ;;  %v181_v12 = vmov 0  }
   0xf   :  { %v33_v2 = vmul.f32 %v29_v0, %v29_v0  ;;  %v34_v3 = vmul.f32 %v30_v1, %v30_v1  ;;  %122 = vset.pattern.permute.xlu1 %v181_v12  ;;  %123 = vset.pattern.permute.xlu0 %v181_v12  ;;  %v31_v13 = vld [vmem:[%s222_s1] sm:$0xf]  ;;  %v80_v29 = vcombine.high %v29_v0, %v29_v0  ;;  %s182_s1 = smov [#allocation5]  }
  0x10   :  { %v32_v14 = vld [vmem:[%s223_s2] sm:$0xf]  ;;  %v81_v33 = vcombine.high %v30_v1, %v30_v1  ;;  %s103_s2 = sshll.u32 %s182_s1, 4  ;;  %s104_s2 = int_to_ptr.vmem [resolvable:$true] %s103_s2 }
  0x11   :  { %v37_v4 = vcombine.high %v33_v2, %v33_v2  ;;  %v42_v5 = vsel %vm41_vm0, %v33_v2, 0.0  ;;  %v38_v6 = vcombine.high %v34_v3, %v34_v3  ;;  %v47_v8 = vsel %vm41_vm0, %v34_v3, 0.0  ;;  %s154_s22 = scalar_lea.vmem %s104_s2, 256  ;;  %p159_p6 = scmp.lt.s32.totalorder %s104_s2, %s104_s2 }
  0x12   :  { %p155_p5 = scmp.ne.s32.totalorder %s104_s2, %s154_s22  ;;  %p160_p7 = scmp.lt.s32.totalorder %s154_s22, %s154_s22 }
  0x13   :  { %v43_v7 = vsel %vm41_vm0, %v37_v4, 0.0  ;;  %v48_v9 = vsel %vm41_vm0, %v38_v6, 0.0 }
  0x14   :  { %v44_v10 = vadd.f32 %v43_v7, %v42_v5  ;;  %v49_v11 = vadd.f32 %v48_v9, %v47_v8  ;;  %p161_p8 = por %p160_p7, %p159_p6 }
  0x16   :  { %45 = vadd.xlane.f32.xlu0 %v44_v10  ;;  %p162_p9 = pnand %p161_p8, %p155_p5 }
  0x1a   :  { %50 = vadd.xlane.f32.xlu0 %v49_v11 }
  0x9f   :  { %v46_v15 = vpop.xlane.xlu0 %45 }
  0xa0   :  { %v52_v16 = vmul.f32 %v46_v15, %v31_v13 }
  0xa2   :  { %v54_v17 = vadd.f32 %v52_v16, %v32_v14 }
  0xa3   :  { %v51_v18 = vpop.xlane.xlu0 %50 }
  0xa4   :  { %v115_v19 = vmul.f32 -1.442695, %v54_v17  ;;  %v53_v20 = vmul.f32 %v51_v18, %v31_v13 }
  0xa6   :  { %126 = vpow2.f32 %v115_v19  ;;  %v55_v21 = vadd.f32 %v53_v20, %v32_v14 }
  0xa8   :  { %v116_v22 = vmul.f32 -1.442695, %v55_v21 }
  0xaa   :  { %128 = vpow2.f32 %v116_v22 }
  0xb3   :  { %v127_v23 = vpop.eup %126 }
  0xb4   :  { %v62_v24 = vadd.f32 1.0, %v127_v23 }
  0xb6   :  { %130 = vrcp.f32 %v62_v24 }
  0xb7   :  { %v129_v25 = vpop.eup %128 }
  0xb8   :  { %v63_v26 = vadd.f32 1.0, %v129_v25 }
  0xba   :  { %132 = vrcp.f32 %v63_v26 }
  0xc3   :  { %v131_v27 = vpop.eup %130 }
  0xc4   :  { %70 = vperm.xlu1 %122, %v131_v27  }
  0xc7   :  { %v133_v28 = vpop.eup %132 }
  0xc8   :  { %75 = vperm.xlu1 %122, %v133_v28  }
 0x13f   :  { %v71_v30 = vpop.permute.xlu1 %70 }
 0x140   :  { %v84_v31 = vmul.f32 %v71_v30, %v29_v0  ;;  %v85_v32 = vmul.f32 %v80_v29, %v71_v30 }
 0x142   :  { %v92_v34 = vcombine.low %v84_v31, %v85_v32 }
 0x143   :  { %v76_v35 = vpop.permute.xlu1 %75 }
 0x144   :  { %96 = vst [vmem:[#allocation5] sm:$0xff] %v92_v34  ;;  %v86_v36 = vmul.f32 %v76_v35, %v30_v1  ;;  %v87_v37 = vmul.f32 %v81_v33, %v76_v35 }
 0x146   :  { %v93_v38 = vcombine.low %v86_v36, %v87_v37 }
 0x148   :  { %97 = vst [vmem:[#allocation5 + $0x8] sm:$0xff] %v93_v38 }
 0x149   :  { %165 = shalt.err (!%p162_p9)
}
 0x14a   :  { %109 = dma.vmem_to_hbm [thread:$0]  %s104_s2, 256, %s224_s3, [#allocation4], %s179_s15, %s179_s15, %s180_s16  }
 0x14b   :  { %176 = dma.done.wait [#allocation4], 256  }
 0x14c   :  { %177 = vsyncadd [#allocation4], 4294967040 }
 0x14d   :  { %113 = vsyncpa [#allocation3], 1 }
 0x14e   :  { %114 = vsyncpa [#allocation4], 1 }

</bundles_post_ra>
